<compile_context>
chip_gen: v7x
topology: tpu7x:2x2x1
jax: 0.10.0
libtpu: 0.0.40
codegen_flags: <defaults>
</compile_context>

<pallas_src>
import jax
import jax.numpy as jnp
from jax import lax
from jax.experimental import pallas as pl
from jax.experimental.pallas import tpu as pltpu

LANES = 128
SUBLANES = 8
MAX_TILE_ROWS = 8192       # 4 MiB f32 per input per grid step
SMALL_MAX_ROWS = 1024      # below this, run the whole array as one block
VMEM_LIMIT_BYTES = 48 << 20  # 16 MiB double-buffered inputs + headroom; < physical on all chips
EPS = 1e-6


def _round_up(x: int, m: int) -> int:
    return ((x + m - 1) // m) * m


def _weighted_sq_err(yp, yt):
    # Cast inside the kernel (HBM traffic stays at native dtype; f32 math on VPU).
    yp = yp.astype(jnp.float32)
    yt = yt.astype(jnp.float32)
    x = (1.0 - jnp.abs(yt - 0.5) * 2.0) + EPS          # x in (eps, 1+eps]
    # log1p(1/x) rewritten as log(x+1) - log(x): shifts the divide off the VALU
    # onto the (otherwise idle) EUP slot; matches torch numerics to ~1 ulp here.
    w = jnp.log(x + 1.0) - jnp.log(x)
    return w * (yp - yt) ** 2


def _small_partial_kernel(yp_ref, yt_ref, out_ref):
    # Whole array in VMEM; emit a VPU-only (8,128) partial (no scalar store).
    contrib = _weighted_sq_err(yp_ref[...], yt_ref[...])
    r = contrib.shape[0]
    out_ref[...] = contrib.reshape(r // SUBLANES, SUBLANES, LANES).sum(axis=0)


def _make_partial_kernel(rows_total: int, tile_rows: int, num_blocks: int):
    ragged = (rows_total % tile_rows) != 0
    last = num_blocks - 1
    tail_valid = rows_total - last * tile_rows   # valid rows inside last block

    def _partial(contrib):
        return contrib.reshape(tile_rows // SUBLANES, SUBLANES, LANES).sum(axis=0)

    def kernel(yp_ref, yt_ref, out_ref):
        contrib = _weighted_sq_err(yp_ref[...], yt_ref[...])
        if not ragged:
            out_ref[...] = _partial(contrib).reshape(1, SUBLANES, LANES)
        else:
            pid = pl.program_id(0)

            @pl.when(pid != last)
            def _():
                out_ref[...] = _partial(contrib).reshape(1, SUBLANES, LANES)

            @pl.when(pid == last)
            def _():
                # Select (not multiply) so garbage/NaN in OOB rows is discarded.
                row = lax.broadcasted_iota(jnp.int32, contrib.shape, 0)
                masked = jnp.where(row < tail_valid, contrib, 0.0)
                out_ref[...] = _partial(masked).reshape(1, SUBLANES, LANES)

    return kernel


def custom_weighted_mse_loss(y_pred: jax.Array, y_true: jax.Array) -> jax.Array:
    assert y_pred.shape == y_true.shape
    n = y_pred.size

    yp = jnp.ravel(y_pred)   # free reshape; keep native dtype (no wrapper upcast)
    yt = jnp.ravel(y_true)

    # Zero padding contributes exactly 0: (yp - yt)^2 == 0 and the weight is finite.
    rem = n % LANES
    if rem:
        # TODO(synk): a 1-D ragged-block kernel with an in-kernel lane mask would
        # avoid this copy for non-lane-aligned element counts (never hit here).
        pad = LANES - rem
        yp = jnp.pad(yp, (0, pad))
        yt = jnp.pad(yt, (0, pad))
    rows = (n + LANES - 1) // LANES

    if rows <= SMALL_MAX_ROWS:
        # Fast path: single whole-array block, no grid / pipeline setup cost.
        row_rem = rows % SUBLANES
        if row_rem:
            pad_rows = SUBLANES - row_rem   # tiny zero-pad; contributes 0
            yp = jnp.pad(yp, (0, pad_rows * LANES))
            yt = jnp.pad(yt, (0, pad_rows * LANES))
            rows += pad_rows
        yp2 = yp.reshape(rows, LANES)
        yt2 = yt.reshape(rows, LANES)
        partial = pl.pallas_call(
            _small_partial_kernel,
            out_shape=jax.ShapeDtypeStruct((SUBLANES, LANES), jnp.float32),
        )(yp2, yt2)
        total = jnp.sum(partial, dtype=jnp.float32)
    else:
        yp2 = yp.reshape(rows, LANES)
        yt2 = yt.reshape(rows, LANES)
        # >= 2 blocks (balanced across TensorCores on v7x), capped at MAX_TILE_ROWS.
        tile_rows = min(MAX_TILE_ROWS, _round_up(pl.cdiv(rows, 2), SUBLANES))
        num_blocks = pl.cdiv(rows, tile_rows)
        partials = pl.pallas_call(
            _make_partial_kernel(rows, tile_rows, num_blocks),
            out_shape=jax.ShapeDtypeStruct((num_blocks, SUBLANES, LANES), jnp.float32),
            grid_spec=pltpu.PrefetchScalarGridSpec(
                num_scalar_prefetch=0,
                grid=(num_blocks,),
                in_specs=[
                    pl.BlockSpec((tile_rows, LANES), lambda i: (i, 0)),
                    pl.BlockSpec((tile_rows, LANES), lambda i: (i, 0)),
                ],
                out_specs=pl.BlockSpec((1, SUBLANES, LANES), lambda i: (i, 0, 0)),
            ),
            compiler_params=pltpu.CompilerParams(
                # Independent per-block partials -> grid shards across both
                # TensorCores on v7x with no shared accumulator to race on.
                dimension_semantics=("parallel",),
                vmem_limit_bytes=VMEM_LIMIT_BYTES,
            ),
        )(yp2, yt2)
        total = jnp.sum(partials, dtype=jnp.float32)

    return total / n


def _reference(y_pred, y_true):
    eps = 1e-6
    w = 1.0 - jnp.abs(y_true - 0.5) * 2.0
    w = jnp.log1p(1.0 / (w + eps))
    return jnp.mean(w * (y_pred - y_true) ** 2)


if __name__ == "__main__":
    key = jax.random.PRNGKey(0)
    k1, k2, k3, k4, k5, k6 = jax.random.split(key, 6)

    # NCHW example (single-block fast path).
    y_pred = jax.random.uniform(k1, (2, 4, 16, 16), dtype=jnp.float32)
    y_true = jax.random.uniform(k2, (2, 4, 16, 16), dtype=jnp.float32)
    loss = custom_weighted_mse_loss(y_pred, y_true)
    jax.block_until_ready(loss)
    ref = _reference(y_pred, y_true)
    assert jnp.allclose(loss, ref, rtol=2e-5, atol=1e-6), (loss, ref)

    # Larger input: tiled parallel grid path, 2 balanced blocks, no ragged tail.
    yp_big = jax.random.uniform(k3, (2, 8, 160, 160), dtype=jnp.float32)
    yt_big = jax.random.uniform(k4, (2, 8, 160, 160), dtype=jnp.float32)
    loss_big = custom_weighted_mse_loss(yp_big, yt_big)
    jax.block_until_ready(loss_big)
    ref_big = _reference(yp_big, yt_big)
    assert jnp.allclose(loss_big, ref_big, rtol=2e-5, atol=1e-6), (loss_big, ref_big)

    # Grid path with a ragged last tile (exercises the pl.when mask branch).
    yp_rag = jax.random.uniform(k5, (2, 8, 161, 160), dtype=jnp.float32)
    yt_rag = jax.random.uniform(k6, (2, 8, 161, 160), dtype=jnp.float32)
    loss_rag = custom_weighted_mse_loss(yp_rag, yt_rag)
    jax.block_until_ready(loss_rag)
    ref_rag = _reference(yp_rag, yt_rag)
    assert jnp.allclose(loss_rag, ref_rag, rtol=2e-5, atol=1e-6), (loss_rag, ref_rag)

    print("KERNEL_OK")
</pallas_src>

<mosaic_0001>
module attributes {stable_mosaic.version = 11 : i64} {
  func.func @_small_partial_kernel(%arg0: memref<16x128xf32, #tpu.memory_space<vmem>>, %arg1: memref<16x128xf32, #tpu.memory_space<vmem>>, %arg2: memref<8x128xf32, #tpu.memory_space<vmem>>) attributes {dimension_semantics = [], scalar_prefetch = 0 : i64, scratch_operands = 0 : i64, tpu.core_type = #tpu.core_type<tc>} {
    %c0 = arith.constant 0 : index
    %c0_0 = arith.constant 0 : index
    %0 = vector.load %arg0[%c0, %c0_0] : memref<16x128xf32, #tpu.memory_space<vmem>>, vector<16x128xf32>
    %c0_1 = arith.constant 0 : index
    %c0_2 = arith.constant 0 : index
    %1 = vector.load %arg1[%c0_1, %c0_2] : memref<16x128xf32, #tpu.memory_space<vmem>>, vector<16x128xf32>
    %cst = arith.constant 5.000000e-01 : f32
    %2 = vector.broadcast %cst : f32 to vector<16x128xf32>
    %3 = arith.subf %1, %2 : vector<16x128xf32>
    %4 = math.absf %3 : vector<16x128xf32>
    %cst_3 = arith.constant 2.000000e+00 : f32
    %5 = vector.broadcast %cst_3 : f32 to vector<16x128xf32>
    %6 = arith.mulf %4, %5 : vector<16x128xf32>
    %cst_4 = arith.constant 1.000000e+00 : f32
    %7 = vector.broadcast %cst_4 : f32 to vector<16x128xf32>
    %8 = arith.subf %7, %6 : vector<16x128xf32>
    %cst_5 = arith.constant 9.99999997E-7 : f32
    %9 = vector.broadcast %cst_5 : f32 to vector<16x128xf32>
    %10 = arith.addf %8, %9 : vector<16x128xf32>
    %cst_6 = arith.constant 1.000000e+00 : f32
    %11 = vector.broadcast %cst_6 : f32 to vector<16x128xf32>
    %12 = arith.addf %10, %11 : vector<16x128xf32>
    %13 = math.log %12 : vector<16x128xf32>
    %14 = math.log %10 : vector<16x128xf32>
    %15 = arith.subf %13, %14 : vector<16x128xf32>
    %16 = arith.subf %0, %1 : vector<16x128xf32>
    %17 = arith.mulf %16, %16 : vector<16x128xf32>
    %18 = arith.mulf %15, %17 : vector<16x128xf32>
    %19 = vector.shape_cast %18 : vector<16x128xf32> to vector<2x8x128xf32>
    %cst_7 = arith.constant dense<0.000000e+00> : vector<8x128xf32>
    %20 = vector.multi_reduction <add>, %19, %cst_7 [0] : vector<2x8x128xf32> to vector<8x128xf32>
    %c0_8 = arith.constant 0 : index
    %c0_9 = arith.constant 0 : index
    %21 = vector.load %arg2[%c0_8, %c0_9] : memref<8x128xf32, #tpu.memory_space<vmem>>, vector<8x128xf32>
    tpu.vector_store %arg2[%c0_8, %c0_9], %20 {strides = array<i32>} : memref<8x128xf32, #tpu.memory_space<vmem>>, vector<8x128xf32>,
    return
  }
}

</mosaic_0001>

<bundles_post_ra>
// kernel: tpu_custom_call.1
= control target key start
LH: loop header
LB: loop body
LE: loop exit
PB: predicated region body
PF: predicated region fallthrough
CT: control target
= control target key end

     0   :  { %7 = vsyncpa [#allocation3], 0  ;;  %s233_s0 = inlined_call_operand.hbm [shape: f32[16,128], index: 0, kind: input, shape index: {}]   ;;  %s234_s1 = inlined_call_operand.hbm [shape: f32[16,128], index: 1, kind: input, shape index: {}]   ;;  %s235_s2 = inlined_call_operand.hbm [shape: f32[8,128], index: 2, kind: output, shape index: {}]  }
   0x1   :  { %8 = vsyncpa [#allocation6], 0 }
   0x2   :  { %9 = vsyncpa [#allocation4], 0  ;;  %s177_s9 = smov [#allocation2]   ;;  %s105_s13 = scalar_lea.hbm %s233_s0, 256 }
   0x3   :  { %s15_s10 = sshll.u32 %s177_s9, 4  ;;  %p106_p0 = scmp.ne.s32.totalorder %s233_s0, %s105_s13  ;;  %s16_s10 = int_to_ptr.vmem [resolvable:$true] %s15_s10 }
   0x4   :  { %p109_p1 = scmp.lt.u32.totalorder %s105_s13, %s233_s0 }
   0x6   :  { %p111_p2 = pnand %p109_p1, %p106_p0 }
   0x8   :  { %114 = shalt.err (!%p111_p2)
}
   0x9   :  { %s115_s18 = scalar_lea.vmem %s16_s10, 256  ;;  %p120_p4 = scmp.lt.s32.totalorder %s16_s10, %s16_s10 }
   0xa   :  { %p116_p3 = scmp.ne.s32.totalorder %s16_s10, %s115_s18  ;;  %p121_p5 = scmp.lt.s32.totalorder %s115_s18, %s115_s18 }
   0xc   :  { %p122_p6 = por %p121_p5, %p120_p4 }
   0xe   :  { %p123_p7 = pnand %p122_p6, %p116_p3 }
  0x10   :  { %126 = shalt.err (!%p123_p7)
}
  0x11   :  { %s178_s19 = smov 128   ;;  %s179_s20 = smov 8  }
  0x12   :  { %21 = dma.hbm_to_vmem [thread:$0]  %s233_s0, 256, %s16_s10, [#allocation3], %s178_s19, %s178_s19, %s179_s20  }
  0x13   :  { %s180_s23 = smov [#allocation5]   ;;  %s127_s27 = scalar_lea.hbm %s234_s1, 256 }
  0x14   :  { %s27_s24 = sshll.u32 %s180_s23, 4  ;;  %p128_p8 = scmp.ne.s32.totalorder %s234_s1, %s127_s27  ;;  %s28_s24 = int_to_ptr.vmem [resolvable:$true] %s27_s24 }
  0x15   :  { %p131_p9 = scmp.lt.u32.totalorder %s127_s27, %s234_s1 }
  0x17   :  { %p133_p10 = pnand %p131_p9, %p128_p8 }
  0x19   :  { %136 = shalt.err (!%p133_p10)
}
  0x1a   :  { %s137_s4 = scalar_lea.vmem %s28_s24, 256  ;;  %p142_p12 = scmp.lt.s32.totalorder %s28_s24, %s28_s24 }
  0x1b   :  { %p138_p11 = scmp.ne.s32.totalorder %s28_s24, %s137_s4  ;;  %p143_p13 = scmp.lt.s32.totalorder %s137_s4, %s137_s4 }
  0x1d   :  { %p144_p0 = por %p143_p13, %p142_p12 }
  0x1f   :  { %p145_p1 = pnand %p144_p0, %p138_p11 }
  0x21   :  { %148 = shalt.err (!%p145_p1)
}
  0x22   :  { %33 = dma.hbm_to_vmem [thread:$0]  %s234_s1, 256, %s28_s24, [#allocation6], %s178_s19, %s178_s19, %s179_s20  }
  0x23   :  { %171 = dma.done.wait [#allocation3], 256  }
  0x24   :  { %172 = vsyncadd [#allocation3], 4294967040 }
  0x25   :  { %173 = dma.done.wait [#allocation6], 256  }
  0x26   :  { %174 = vsyncadd [#allocation6], 4294967040  ;;  %v42_v0 = vld [vmem:[#allocation5] sm:$0xff]  ;;  %v43_v1 = vld [vmem:[#allocation5 + $0x8] sm:$0xff]  ;;  %s181_s1 = smov [#allocation7]  }
  0x27   :  { %v90_v2 = vadd.f32 -0.5, %v42_v0  ;;  %v91_v3 = vadd.f32 -0.5, %v43_v1  ;;  %v40_v14 = vld [vmem:[#allocation2] sm:$0xff]  ;;  %v41_v15 = vld [vmem:[#allocation2 + $0x8] sm:$0xff]  ;;  %s80_s6 = sshll.u32 %s181_s1, 4  ;;  %s81_s6 = int_to_ptr.vmem [resolvable:$true] %s80_s6 }
  0x28   :  { %v66_v16 = vsub.f32 %v40_v14, %v42_v0  ;;  %v67_v18 = vsub.f32 %v41_v15, %v43_v1  ;;  %s149_s7 = scalar_lea.vmem %s81_s6, 128  ;;  %p154_p3 = scmp.lt.s32.totalorder %s81_s6, %s81_s6 }
  0x29   :  { %v46_v4 = vand.u32 2147483647, %v90_v2  ;;  %v47_v5 = vand.u32 2147483647, %v91_v3  ;;  %p150_p2 = scmp.ne.s32.totalorder %s81_s6, %s149_s7  ;;  %p155_p4 = scmp.lt.s32.totalorder %s149_s7, %s149_s7 }
  0x2a   :  { %v68_v25 = vmul.f32 %v66_v16, %v66_v16  ;;  %v69_v27 = vmul.f32 %v67_v18, %v67_v18 }
  0x2b   :  { %v48_v6 = vmul.f32 2.0, %v46_v4  ;;  %v49_v7 = vmul.f32 2.0, %v47_v5  ;;  %p156_p5 = por %p155_p4, %p154_p3 }
  0x2d   :  { %v50_v8 = vsub.f32 1.0, %v48_v6  ;;  %v51_v9 = vsub.f32 1.0, %v49_v7  ;;  %p157_p6 = pnand %p156_p5, %p150_p2 }
  0x2f   :  { %v52_v10 = vadd.f32 1e-06, %v50_v8  ;;  %v53_v11 = vadd.f32 1e-06, %v51_v9 }
  0x31   :  { %v54_v12 = vadd.f32 1.0, %v52_v10  ;;  %97 = vlog2.f32 %v52_v10  ;;  %v55_v13 = vadd.f32 1.0, %v53_v11 }
  0x32   :  { %99 = vlog2.f32 %v53_v11 }
  0x33   :  { %101 = vlog2.f32 %v54_v12 }
  0x34   :  { %103 = vlog2.f32 %v55_v13 }
  0x3b   :  { %v98_v17 = vpop.eup %97 }
  0x3c   :  { %v100_v19 = vpop.eup %99  ;;  %v61_v20 = vmul.f32 0.6931472, %v98_v17 }
  0x3d   :  { %v102_v21 = vpop.eup %101  ;;  %v63_v22 = vmul.f32 0.6931472, %v100_v19 }
  0x3e   :  { %v104_v23 = vpop.eup %103  ;;  %v57_v24 = vmul.f32 0.6931472, %v102_v21 }
  0x3f   :  { %v59_v26 = vmul.f32 0.6931472, %v104_v23 }
  0x40   :  { %v64_v28 = vsub.f32 %v57_v24, %v61_v20 }
  0x41   :  { %v65_v29 = vsub.f32 %v59_v26, %v63_v22 }
  0x42   :  { %v70_v30 = vmul.f32 %v68_v25, %v64_v28 }
  0x43   :  { %v71_v31 = vmul.f32 %v69_v27, %v65_v29 }
  0x45   :  { %v72_v32 = vadd.f32 %v71_v31, %v70_v30 }
  0x47   :  { %73 = vst [vmem:[#allocation7] sm:$0xff] %v72_v32 }
  0x48   :  { %160 = shalt.err (!%p157_p6)
}
  0x49   :  { %s161_s10 = scalar_lea.hbm %s235_s2, 128 }
  0x4a   :  { %p162_p7 = scmp.ne.s32.totalorder %s235_s2, %s161_s10  ;;  %p165_p8 = scmp.lt.u32.totalorder %s161_s10, %s235_s2 }
  0x4c   :  { %p167_p9 = pnand %p165_p8, %p162_p7 }
  0x4e   :  { %170 = shalt.err (!%p167_p9)
}
  0x4f   :  { %83 = dma.vmem_to_hbm [thread:$0]  %s81_s6, 128, %s235_s2, [#allocation4]  }
  0x50   :  { %175 = dma.done.wait [#allocation4], 128  }
  0x51   :  { %176 = vsyncadd [#allocation4], 4294967168 }
  0x52   :  { %87 = vsyncpa [#allocation3], 1 }
  0x53   :  { %88 = vsyncpa [#allocation6], 1 }
  0x54   :  { %89 = vsyncpa [#allocation4], 1 }

</bundles_post_ra>
